<compile_context>
chip_gen: v6e
topology: v6e:2x2x1
jax: 0.10.0
libtpu: 0.0.40
codegen_flags: <defaults>
</compile_context>

<pallas_src>
import functools
import math

import jax
import jax.numpy as jnp
from jax import lax
from jax.experimental import pallas as pl
from jax.experimental.pallas import tpu as pltpu

_LANES = 128
_SUBLANES = 8
_BN_EPS = 1e-5
_INV_SQRT2 = 1.0 / math.sqrt(2.0)


def _cdiv(a, b):
    return -(-a // b)


def _round_up(x, m):
    return (x + m - 1) // m * m


def _vmem_capacity_bytes():
    """Physical VMEM per core: 128 MiB on v5e/v6e, 64 MiB on v7x (fallback)."""
    try:
        cap = getattr(pltpu.get_tpu_info(), "vmem_capacity_bytes", 0)
        if cap:
            return int(cap)
    except Exception:
        pass
    return 64 * 1024 * 1024


def _gelu_exact(a):
    # PyTorch nn.GELU default (erf-based).
    return 0.5 * a * (1.0 + lax.erf(a * jnp.float32(_INV_SQRT2)))


# ---------------------------------------------------------------------------
# Pass 1: per-feature batch statistics of z = x @ W1 (per-core accumulators).
# ---------------------------------------------------------------------------
def _stats_common(x_ref, w1_ref, z_ref, sum_ref, sumsq_ref,
                  batch, tile_rows, tiles_per_core):
    i = pl.program_id(1)

    @pl.when(i == 0)
    def _():
        sum_ref[...] = jnp.zeros_like(sum_ref)
        sumsq_ref[...] = jnp.zeros_like(sumsq_ref)

    # Native-dtype operands straight to the MXU; f32 accumulation.
    z = jnp.dot(x_ref[...], w1_ref[...], preferred_element_type=jnp.float32)
    if z_ref is not None:
        z_ref[...] = z.astype(z_ref.dtype)

    # Mask rows past the true batch: covers the ragged last tile and any
    # clamped duplicate tiles introduced by the 2-way core split.
    tile = pl.program_id(0) * tiles_per_core + i
    rows = tile * tile_rows + lax.broadcasted_iota(jnp.int32, (z.shape[0], 1), 0)
    zm = jnp.where(rows < batch, z, 0.0)

    sum_ref[0:1, :] = sum_ref[0:1, :] + jnp.sum(zm, axis=0, keepdims=True)
    sumsq_ref[0:1, :] = sumsq_ref[0:1, :] + jnp.sum(zm * zm, axis=0, keepdims=True)


def _stats_kernel(x_ref, w1_ref, sum_ref, sumsq_ref, *,
                  batch, tile_rows, tiles_per_core):
    _stats_common(x_ref, w1_ref, None, sum_ref, sumsq_ref,
                  batch, tile_rows, tiles_per_core)


def _stats_cache_kernel(x_ref, w1_ref, sum_ref, sumsq_ref, z_ref, *,
                        batch, tile_rows, tiles_per_core):
    _stats_common(x_ref, w1_ref, z_ref, sum_ref, sumsq_ref,
                  batch, tile_rows, tiles_per_core)


# ---------------------------------------------------------------------------
# Pass 2: folded-BN affine, exact GELU, Linear2 into a lane-dense N-tiled slab.
# The GELU intermediate is computed once per batch tile (j == 0) into a VMEM
# scratch and reused for every output-column tile.
# ---------------------------------------------------------------------------
def _apply_x_kernel(x_ref, w1_ref, scale_ref, shift_ref, w2_ref, b2_ref,
                    o_ref, g_ref):
    @pl.when(pl.program_id(1) == 0)
    def _():
        z = jnp.dot(x_ref[...], w1_ref[...], preferred_element_type=jnp.float32)
        a = z * scale_ref[...] + shift_ref[...]
        g_ref[...] = _gelu_exact(a)

    out = jnp.dot(g_ref[...].astype(w2_ref.dtype), w2_ref[...],
                  preferred_element_type=jnp.float32) + b2_ref[...]
    o_ref[...] = out.astype(o_ref.dtype)


def _apply_z_kernel(z_ref, scale_ref, shift_ref, w2_ref, b2_ref, o_ref, g_ref):
    @pl.when(pl.program_id(1) == 0)
    def _():
        a = z_ref[...].astype(jnp.float32) * scale_ref[...] + shift_ref[...]
        g_ref[...] = _gelu_exact(a)

    out = jnp.dot(g_ref[...].astype(w2_ref.dtype), w2_ref[...],
                  preferred_element_type=jnp.float32) + b2_ref[...]
    o_ref[...] = out.astype(o_ref.dtype)


def _choose_tile_rows(batch, in_dim, hidden_pad, tn, itemsize, requested, budget):
    # Resident weights/params are double-buffered by the pipeline even with a
    # constant index_map -> count 2x in the budget.
    resident = 2 * itemsize * (in_dim * hidden_pad + hidden_pad * tn)
    resident += 2 * 4 * (2 * hidden_pad + tn)
    avail = max(budget - resident, 1 << 20)
    # Per batch-row: double-buffered x tile + out tile + (possible) cached-z
    # stream, plus f32 hidden-width intermediates / GELU scratch.
    per_row = itemsize * (2 * in_dim + 2 * tn + 2 * hidden_pad) + 4 * 4 * hidden_pad
    tb = min(requested, max(int(avail // per_row), _SUBLANES))
    if tb >= batch:
        return batch                       # single full-batch tile (full-dim block)
    return max(_SUBLANES, (tb // _SUBLANES) * _SUBLANES)


def recommend_network_forward(x, w1, b1, gamma, beta, w2, b2, *,
                              block_rows=8192, block_cols=2048):
    """x: [B, in_dim]; w1: [in_dim, 64], w2: [64, out_dim] (PyTorch weight.T);
    b1/gamma/beta: [1, 64]; b2: [1, out_dim].  f32 or bf16 x accepted (weights
    are cast to x.dtype for native MXU matmuls; accumulation is f32).  Output
    dtype matches x.  b1 is accepted for API parity only: Linear1's bias cancels
    exactly under training-mode BatchNorm."""
    B, in_dim = x.shape
    hidden = w1.shape[1]
    out_dim = w2.shape[1]
    hidden_pad = _round_up(hidden, _LANES)

    f32 = jnp.float32
    cdt = x.dtype
    itemsize = x.dtype.itemsize

    # Lane-dense, optionally N-tiled output slab.
    out_pad0 = _round_up(out_dim, _LANES)
    block_cols = max(_LANES, _round_up(block_cols, _LANES))
    num_n = max(1, _cdiv(out_pad0, block_cols))
    tn = _round_up(_cdiv(out_pad0, num_n), _LANES)
    out_pad = tn * num_n

    # Per-generation VMEM sizing.
    vmem_cap = _vmem_capacity_bytes()
    vmem_limit = int(vmem_cap * 0.75)
    tile_budget = int(vmem_cap * 0.55)

    tb = _choose_tile_rows(B, in_dim, hidden_pad, tn, itemsize, block_rows,
                           tile_budget)
    total_tiles = _cdiv(B, tb)
    core_splits = 2 if total_tiles >= 2 else 1       # use both v7x TensorCores
    tiles_per_core = _cdiv(total_tiles, core_splits)

    # Cache z = x@W1 between passes when re-reading x would cost more HBM
    # bandwidth than a z round trip.
    cache_z = in_dim > 2 * hidden_pad

    # Hidden padded 64->128 lanes; weights cast to x.dtype for native MXU.
    w1p = jnp.pad(w1, ((0, 0), (0, hidden_pad - hidden))).astype(cdt)
    w2p = jnp.pad(w2, ((0, hidden_pad - hidden), (0, out_pad - out_dim))).astype(cdt)
    b2p = jnp.pad(b2.reshape(1, out_dim).astype(f32), ((0, 0), (0, out_pad - out_dim)))
    gamma_p = jnp.pad(gamma.reshape(1, hidden).astype(f32),
                      ((0, 0), (0, hidden_pad - hidden)))
    beta_p = jnp.pad(beta.reshape(1, hidden).astype(f32),
                     ((0, 0), (0, hidden_pad - hidden)))

    # ---- Pass 1: full-batch statistics (exact BN despite batch tiling). ----
    def x_map(c, i):
        # Clamp: odd tile counts give one duplicate (fully masked) iteration.
        return (jnp.minimum(c * tiles_per_core + i, total_tiles - 1), 0)

    acc_spec = pl.BlockSpec((_SUBLANES, hidden_pad), lambda c, i: (c, 0))
    acc_shape = jax.ShapeDtypeStruct((core_splits * _SUBLANES, hidden_pad), f32)

    stats_in_specs = (
        pl.BlockSpec((tb, in_dim), x_map),
        pl.BlockSpec((in_dim, hidden_pad), lambda c, i: (0, 0)),   # resident W1
    )
    stats_out_specs = [acc_spec, acc_spec]
    stats_out_shape = [acc_shape, acc_shape]
    if cache_z:
        stats_kern = functools.partial(_stats_cache_kernel, batch=B,
                                       tile_rows=tb, tiles_per_core=tiles_per_core)
        stats_out_specs.append(pl.BlockSpec((tb, hidden_pad), x_map))
        stats_out_shape.append(jax.ShapeDtypeStruct((B, hidden_pad), cdt))
    else:
        stats_kern = functools.partial(_stats_kernel, batch=B,
                                       tile_rows=tb, tiles_per_core=tiles_per_core)

    stats_out = pl.pallas_call(
        stats_kern,
        grid=(core_splits, tiles_per_core),
        in_specs=stats_in_specs,
        out_specs=tuple(stats_out_specs),
        out_shape=tuple(stats_out_shape),
        compiler_params=pltpu.CompilerParams(
            dimension_semantics=("parallel", "arbitrary"),
            vmem_limit_bytes=vmem_limit),
    )(x, w1p)

    if cache_z:
        zsum, zsq, z_cached = stats_out
    else:
        (zsum, zsq), z_cached = stats_out, None

    # ---- Fold BatchNorm (training-mode, biased variance) into scale/shift. ----
    zsum = jnp.sum(zsum, axis=0, keepdims=True)     # collapse per-core partials
    zsq = jnp.sum(zsq, axis=0, keepdims=True)
    mean = zsum / f32(B)
    var = jnp.maximum(zsq / f32(B) - mean * mean, 0.0)
    scale = gamma_p * lax.rsqrt(var + f32(_BN_EPS))
    shift = beta_p - mean * scale

    # ---- Pass 2: BN affine + exact GELU + Linear2 (batch-parallel, N-tiled). ----
    common_specs = [
        pl.BlockSpec((1, hidden_pad), lambda i, j: (0, 0)),       # scale
        pl.BlockSpec((1, hidden_pad), lambda i, j: (0, 0)),       # shift
        pl.BlockSpec((hidden_pad, tn), lambda i, j: (0, j)),      # W2 column tile
        pl.BlockSpec((1, tn), lambda i, j: (0, j)),               # b2 column tile
    ]
    if cache_z:
        apply_kern = _apply_z_kernel
        lead_specs = [pl.BlockSpec((tb, hidden_pad), lambda i, j: (i, 0))]
        lead_args = (z_cached,)
    else:
        apply_kern = _apply_x_kernel
        lead_specs = [pl.BlockSpec((tb, in_dim), lambda i, j: (i, 0)),
                      pl.BlockSpec((in_dim, hidden_pad), lambda i, j: (0, 0))]
        lead_args = (x, w1p)

    out = pl.pallas_call(
        apply_kern,
        grid=(total_tiles, num_n),
        in_specs=tuple(lead_specs + common_specs),
        out_specs=pl.BlockSpec((tb, tn), lambda i, j: (i, j)),
        out_shape=jax.ShapeDtypeStruct((B, out_pad), x.dtype),
        scratch_shapes=[pltpu.VMEM((tb, hidden_pad), f32)],
        compiler_params=pltpu.CompilerParams(
            dimension_semantics=("parallel", "arbitrary"),
            vmem_limit_bytes=vmem_limit),
    )(*lead_args, scale, shift, w2p, b2p)

    if out_pad != out_dim:
        out = out[:, :out_dim]
    return out


def recommend_reference(x, w1, b1, gamma, beta, w2, b2):
    """Pure-JAX reference: PyTorch train-mode BN forward, exact GELU, eval Dropout."""
    h = x @ w1 + b1
    mean = jnp.mean(h, axis=0, keepdims=True)
    var = jnp.mean((h - mean) ** 2, axis=0, keepdims=True)
    h = (h - mean) * lax.rsqrt(var + jnp.float32(_BN_EPS))
    h = h * gamma + beta
    h = 0.5 * h * (1.0 + lax.erf(h * jnp.float32(_INV_SQRT2)))
    return h @ w2 + b2


def init_params(key, input_size, output_size, hidden=64):
    """Matches Recommend_Network.initalize_weights():
       Linear weights ~ kaiming_uniform_(a=0) => U(-sqrt(6/fan_in), sqrt(6/fan_in)),
       Linear biases = 0, BN weight = 1, BN bias = 0."""
    k1, k2 = jax.random.split(key)
    bound1 = math.sqrt(6.0 / input_size)
    w1 = jax.random.uniform(k1, (hidden, input_size), jnp.float32, -bound1, bound1).T
    b1 = jnp.zeros((1, hidden), jnp.float32)
    gamma = jnp.ones((1, hidden), jnp.float32)
    beta = jnp.zeros((1, hidden), jnp.float32)
    bound2 = math.sqrt(6.0 / hidden)
    w2 = jax.random.uniform(k2, (output_size, hidden), jnp.float32, -bound2, bound2).T
    b2 = jnp.zeros((1, output_size), jnp.float32)
    return w1, b1, gamma, beta, w2, b2


if __name__ == "__main__":
    key = jax.random.PRNGKey(0)
    kx1, kp1, kx2, kp2 = jax.random.split(key, 4)
    B = 250

    # Case 1: small in/out dims -> recompute path; block_rows=64 forces multiple
    # ragged batch tiles, the 2-way core split in the stats pass, and output
    # column padding/slicing.
    in1, out1 = 32, 16
    x1 = jax.random.normal(kx1, (B, in1), jnp.float32)
    p1 = init_params(kp1, in1, out1)
    y1 = recommend_network_forward(x1, *p1, block_rows=64)
    jax.block_until_ready(y1)
    assert y1.shape == (B, out1) and y1.dtype == jnp.float32
    r1 = recommend_reference(x1, *p1)
    assert jnp.allclose(y1, r1, atol=1e-2, rtol=1e-2), (
        f"case1 max abs err {float(jnp.max(jnp.abs(y1 - r1)))}")

    # Case 2: wide input -> cached-z path (x read from HBM once); wide output +
    # block_cols=128 -> N-tiled pass 2 with the GELU scratch reused across tiles.
    in2, out2 = 300, 200
    x2 = jax.random.normal(kx2, (B, in2), jnp.float32)
    p2 = init_params(kp2, in2, out2)
    y2 = recommend_network_forward(x2, *p2, block_rows=64, block_cols=128)
    jax.block_until_ready(y2)
    assert y2.shape == (B, out2) and y2.dtype == jnp.float32
    r2 = recommend_reference(x2, *p2)
    assert jnp.allclose(y2, r2, atol=1e-2, rtol=1e-2), (
        f"case2 max abs err {float(jnp.max(jnp.abs(y2 - r2)))}")

    print("KERNEL_OK")
</pallas_src>

<mosaic_0001>
module attributes {stable_mosaic.version = 11 : i64} {
  func.func @_stats_kernel(%arg0: i32, %arg1: i32, %arg2: memref<64x32xf32, #tpu.memory_space<vmem>>, %arg3: memref<32x128xf32, #tpu.memory_space<vmem>>, %arg4: memref<8x128xf32, #tpu.memory_space<vmem>>, %arg5: memref<8x128xf32, #tpu.memory_space<vmem>>) attributes {dimension_semantics = [#tpu.dimension_semantics<parallel>, #tpu.dimension_semantics<arbitrary>], iteration_bounds = array<i64: 2, 2>, scalar_prefetch = 0 : i64, scratch_operands = 0 : i64, tpu.core_type = #tpu.core_type<tc>, window_params = [{transform_indices = @transform_0, window_bounds = array<i64: 64, 32>}, {pipeline_mode = #tpu.pipeline_mode<synchronous>, transform_indices = @transform_1, window_bounds = array<i64: 32, 128>}, {transform_indices = @transform_2, window_bounds = array<i64: 8, 128>}, {transform_indices = @transform_3, window_bounds = array<i64: 8, 128>}]} {
    %c0_i32 = arith.constant 0 : i32
    %0 = arith.cmpi eq, %arg1, %c0_i32 : i32
    %1 = arith.extui %0 : i1 to i32
    %c0_i32_0 = arith.constant 0 : i32
    %2 = arith.cmpi ne, %1, %c0_i32_0 : i32
    scf.if %2 {
      %cst_15 = arith.constant 0.000000e+00 : f32
      %29 = vector.broadcast %cst_15 : f32 to vector<8x128xf32>
      %c0_16 = arith.constant 0 : index
      %c0_17 = arith.constant 0 : index
      %30 = vector.load %arg4[%c0_16, %c0_17] : memref<8x128xf32, #tpu.memory_space<vmem>>, vector<8x128xf32>
      tpu.vector_store %arg4[%c0_16, %c0_17], %29 {strides = array<i32>} : memref<8x128xf32, #tpu.memory_space<vmem>>, vector<8x128xf32>,
      %cst_18 = arith.constant 0.000000e+00 : f32
      %31 = vector.broadcast %cst_18 : f32 to vector<8x128xf32>
      %c0_19 = arith.constant 0 : index
      %c0_20 = arith.constant 0 : index
      %32 = vector.load %arg5[%c0_19, %c0_20] : memref<8x128xf32, #tpu.memory_space<vmem>>, vector<8x128xf32>
      tpu.vector_store %arg5[%c0_19, %c0_20], %31 {strides = array<i32>} : memref<8x128xf32, #tpu.memory_space<vmem>>, vector<8x128xf32>,
    } else {
    }
    %c0 = arith.constant 0 : index
    %c0_1 = arith.constant 0 : index
    %3 = vector.load %arg2[%c0, %c0_1] : memref<64x32xf32, #tpu.memory_space<vmem>>, vector<64x32xf32>
    %c0_2 = arith.constant 0 : index
    %c0_3 = arith.constant 0 : index
    %4 = vector.load %arg3[%c0_2, %c0_3] : memref<32x128xf32, #tpu.memory_space<vmem>>, vector<32x128xf32>
    %cst = arith.constant dense<0.000000e+00> : vector<64x128xf32>
    %5 = tpu.matmul %3, %4, %cst {dimension_numbers = #tpu.dot_dimension_numbers<[1], [0], [0], [1], [0, 0, 1, 1], [], []>} : vector<64x32xf32>, vector<32x128xf32>, vector<64x128xf32> -> vector<64x128xf32>
    %c2_i32 = arith.constant 2 : i32
    %6 = arith.muli %arg0, %c2_i32 : i32
    %7 = arith.addi %6, %arg1 : i32
    %c64_i32 = arith.constant 64 : i32
    %8 = arith.muli %7, %c64_i32 : i32
    %9 = tpu.iota {dimensions = array<i32: 0>} : vector<64x1xi32>
    %10 = vector.broadcast %8 : i32 to vector<64x1xi32>
    %11 = arith.addi %10, %9 : vector<64x1xi32>
    %c250_i32 = arith.constant 250 : i32
    %12 = vector.broadcast %c250_i32 : i32 to vector<64x1xi32>
    %13 = arith.cmpi slt, %11, %12 : vector<64x1xi32>
    %cst_4 = arith.constant 0.000000e+00 : f32
    %14 = vector.shape_cast %13 : vector<64x1xi1> to vector<64x1xi1>
    %15 = vector.broadcast %14 : vector<64x1xi1> to vector<64x128xi1>
    %16 = vector.broadcast %cst_4 : f32 to vector<64x128xf32>
    %17 = arith.select %15, %5, %16 : vector<64x128xi1>, vector<64x128xf32>
    %c0_5 = arith.constant 0 : index
    %c0_6 = arith.constant 0 : index
    %18 = vector.load %arg4[%c0_5, %c0_6] : memref<8x128xf32, #tpu.memory_space<vmem>>, vector<1x128xf32>
    %cst_7 = arith.constant dense<0.000000e+00> : vector<128xf32>
    %19 = vector.multi_reduction <add>, %17, %cst_7 [0] : vector<64x128xf32> to vector<128xf32>
    %20 = vector.shape_cast %19 : vector<128xf32> to vector<1x128xf32>
    %21 = arith.addf %18, %20 : vector<1x128xf32>
    %c0_8 = arith.constant 0 : index
    %c0_9 = arith.constant 0 : index
    %22 = vector.load %arg4[%c0_8, %c0_9] : memref<8x128xf32, #tpu.memory_space<vmem>>, vector<1x128xf32>
    tpu.vector_store %arg4[%c0_8, %c0_9], %21 {strides = array<i32>} : memref<8x128xf32, #tpu.memory_space<vmem>>, vector<1x128xf32>,
    %c0_10 = arith.constant 0 : index
    %c0_11 = arith.constant 0 : index
    %23 = vector.load %arg5[%c0_10, %c0_11] : memref<8x128xf32, #tpu.memory_space<vmem>>, vector<1x128xf32>
    %24 = arith.mulf %17, %17 : vector<64x128xf32>
    %cst_12 = arith.constant dense<0.000000e+00> : vector<128xf32>
    %25 = vector.multi_reduction <add>, %24, %cst_12 [0] : vector<64x128xf32> to vector<128xf32>
    %26 = vector.shape_cast %25 : vector<128xf32> to vector<1x128xf32>
    %27 = arith.addf %23, %26 : vector<1x128xf32>
    %c0_13 = arith.constant 0 : index
    %c0_14 = arith.constant 0 : index
    %28 = vector.load %arg5[%c0_13, %c0_14] : memref<8x128xf32, #tpu.memory_space<vmem>>, vector<1x128xf32>
    tpu.vector_store %arg5[%c0_13, %c0_14], %27 {strides = array<i32>} : memref<8x128xf32, #tpu.memory_space<vmem>>, vector<1x128xf32>,
    return
  }
  func.func @transform_0(%arg0: i32, %arg1: i32) -> (i32, i32) {
    %c2_i32 = arith.constant 2 : i32
    %0 = arith.muli %arg0, %c2_i32 : i32
    %1 = arith.addi %0, %arg1 : i32
    %c3_i32 = arith.constant 3 : i32
    %2 = arith.minsi %1, %c3_i32 : i32
    %c0_i32 = arith.constant 0 : i32
    %c0_i32_0 = arith.constant 0 : i32
    return %2, %c0_i32 : i32, i32
  }
  func.func @transform_1(%arg0: i32, %arg1: i32) -> (i32, i32) {
    %c0_i32 = arith.constant 0 : i32
    %c0_i32_0 = arith.constant 0 : i32
    %c0_i32_1 = arith.constant 0 : i32
    return %c0_i32, %c0_i32_0 : i32, i32
  }
  func.func @transform_2(%arg0: i32, %arg1: i32) -> (i32, i32) {
    %c0_i32 = arith.constant 0 : i32
    %c0_i32_0 = arith.constant 0 : i32
    return %arg0, %c0_i32 : i32, i32
  }
  func.func @transform_3(%arg0: i32, %arg1: i32) -> (i32, i32) {
    %c0_i32 = arith.constant 0 : i32
    %c0_i32_0 = arith.constant 0 : i32
    return %arg0, %c0_i32 : i32, i32
  }
}

</mosaic_0001>

<bundles_post_ra>
// kernel: tpu_custom_call.1
= control target key start
LH: loop header
LB: loop body
LE: loop exit
PB: predicated region body
PF: predicated region fallthrough
CT: control target
= control target key end

     0   :  { %9 = vsyncpa [#allocation3], 0  ;;  %s1101_s0 = inlined_call_operand.vmem [shape: f32[250,32], index: 0, kind: input, shape index: {}]   ;;  %s1102_s1 = inlined_call_operand.vmem [shape: f32[32,128], index: 1, kind: input, shape index: {}]   ;;  %s1103_s2 = inlined_call_operand.hbm [shape: f32[16,128], index: 2, kind: output, shape index: {0}]   ;;  %s1104_s3 = inlined_call_operand.hbm [shape: f32[16,128], index: 3, kind: output, shape index: {1}]  }
   0x1   :  { %11 = vsyncpa [#allocation3 + $0x1], 0 }
   0x2   :  { %12 = vsyncpa [#allocation5], 0 }
   0x3   :  { %14 = vsyncpa [#allocation5 + $0x1], 0  ;;  %s890_s12 = smov 0   ;;  %s892_s13 = smov 0  }
   0x4   :  { %s894_s14 = smov 0   ;;  %s896_s15 = smov 0  }
   0x5   :  { %s898_s16 = smov 0   ;;  %s900_s17 = smov 0  }
   0x6   :  { %s902_s18 = smov 0   ;;  %s904_s19 = smov 0  }
   0x7 LB: > { %s597_s20 = sadd.s32 4294967295, %s865_s19   ;;  %s598_s21 = sadd.s32 4294967294, %s865_s19   ;;  %s865_s19 = sphi %s904_s19, %s20_s19   ;;  %s861_s18 = sphi %s902_s18, %s1113_s18   ;;  %s857_s17 = sphi %s900_s17, %s1112_s17   ;;  %s853_s16 = sphi %s898_s16, %s1111_s16   ;;  %s849_s15 = sphi %s896_s15, %s1110_s15   ;;  %s845_s14 = sphi %s894_s14, %s1109_s14   ;;  %s841_s13 = sphi %s892_s13, %s1108_s13   ;;  %s837_s12 = sphi %s890_s12, %s1107_s12  }
   0x8   : > { %s29_s22 = sadd.s32 1, %s857_s17  ;;  %s32_s23 = sadd.s32 1, %s861_s18 }
   0x9   : > { %p30_p0 = scmp.ge.s32.totalorder %s29_s22, 2  ;;  %p104_p1 = scmp.ne.s32.totalorder %s845_s14, %s841_s13 }
   0xa   : > { %p105_p2 = scmp.eq.s32.totalorder %s597_s20, 3  ;;  %p110_p4 = scmp.ne.s32.totalorder %s841_s13, %s837_s12 }
   0xb   : > { %s1115_s22 = smov (%p30_p0, %s29_s22), 0  ;;  %s1117_s23 = smov (!%p30_p0, %s32_s23), %s861_s18 }
   0xc   : > { %p939_p3 = por %p105_p2, %p104_p1  ;;  %p34_p5 = scmp.ge.s32.totalorder %s1117_s23, 2 }
   0xd   : > { %p111_p6 = scmp.eq.s32.totalorder %s598_s21, 3  ;;  %p603_p7 = scmp.ge.s32.totalorder %s865_s19, 1 }
   0xe   : > { %p175_p8 = scmp.lt.s32.totalorder %s865_s19, 5  ;;  %s1119_s23 = smov (%p34_p5, %s1117_s23), 0 }
   0xf   : > { %p949_p9 = por %p111_p6, %p110_p4  ;;  %s91_s26 = ssub.s32 %s861_s18, %s1119_s23 }
  0x10   : > { %p176_p10 = pnand %p603_p7, %p175_p8  ;;  %s94_s27 = sadd.s32 1, %s845_s14 }
  0x11   : > { %p92_p11 = scmp.eq.s32.totalorder %s91_s26, 0  ;;  %s960_s29 = sand.u32 (!%p176_p10), 1, %s841_s13  }
  0x12   : > { %179 = sbr.rel (%p176_p10) target bundleno = 303 (0x12f), region = 28  ;;  %s606_s30 = sshll.u32 (!%p176_p10), %s853_s16, 1 }
  0x13   : > { %s957_s28 = scalar_select %p92_p11, %s845_s14, %s94_s27  }
  0x14   : > { %s604_s4 = sshll.u32 (!%p176_p10), %s960_s29, 3  ;;  %s965_s5 = sadd.s32 (!%p176_p10), %s849_s15, %s606_s30 }
  0x15   : > { %p210_p12 = scmp.lt.s32.totalorder (!%p176_p10), %s965_s5, 3  ;;  %s974_s20 = scalar_lea.vmem (!%p176_p10), [#allocation2], %s604_s4 }
  0x16   : > { %s976_s21 = scalar_lea.vmem (!%p176_p10), [#allocation4], %s604_s4  ;;  %p609_p0 = scmp.ne.s32.totalorder (!%p176_p10), %s849_s15, 0 }
  0x17   : > { %s211_s6 = scalar_select %p210_p12, %s965_s5, 3 }
  0x19   : > { %s607_s7 = sshll.u32 %s211_s6, 3 }
  0x1a   : > { %p213_p13 = scmp.lt.s32.totalorder %s607_s7, 31  ;;  %225 = sbr.rel (%p609_p0) target bundleno = 33 (0x21), region = 32 }
  0x1c   : > { %s1121_s7 = smov (!%p213_p13, %s607_s7), 31 }
  0x1d   : > { %s608_s8 = sshll.u32 %s1121_s7, 3 }
  0x1e   : > { %s972_s11 = scalar_lea.vmem %s1101_s0, %s608_s8 }
  0x1f   : > { %v867_v0 = vmov 0.0  }
  0x20   : > { %226 = vst [vmem:[%s974_s20] sm:$0xff] %v867_v0  ;;  %227 = vst [vmem:[%s976_s21] sm:$0xff] %v867_v0 }
  0x21 PF: > { %v239_v1 = vld [vmem:[%s1102_s1 + $0x18] sm:$0xff]  ;;  %v238_v2 = vld [vmem:[%s1102_s1 + $0x10] sm:$0xff]  ;;  %vm240_vm0 = vcmask 261120   ;;  %v228_v3 = vld [vmem:[%s972_s11] sm:$0xff]  ;;  %v373_v13 = vlaneseq  ;;  %s619_s9 = sshll.u32 %s965_s5, 6  ;;  %s622_s5 = sshll.u32 %s853_s16, 7 }
  0x22   : > { %638 = vmatprep.subr.mxu0 %v239_v1  ;;  %658 = vmatprep.subr.mxu1 %v239_v1  ;;  %v237_v4 = vld [vmem:[%s1102_s1 + $0x8] sm:$0xff]  ;;  %v236_v5 = vld [vmem:[%s1102_s1] sm:$0xff]  ;;  %v230_v7 = vld [vmem:[%s972_s11 + $0x10] sm:$0xff]  ;;  %v382_v16 = vstv %s619_s9  ;;  %s482_s10 = sshll.u32 %s974_s20, 4  ;;  %s1018_s30 = scalar_lea.hbm %s1103_s2, %s622_s5  ;;  %s1020_s10 = int_to_ptr.vmem [resolvable:$true] %s482_s10 }
  0x23   : > { %639 = vmatpush3.msra.mxu0 %v239_v1  ;;  %662 = vmatpush3.msra.mxu1 %v239_v1  ;;  %v229_v6 = vld [vmem:[%s972_s11 + $0x8] sm:$0xff]  ;;  %v232_v8 = vld [vmem:[%s972_s11 + $0x20] sm:$0xff]  ;;  %v234_v10 = vld [vmem:[%s972_s11 + $0x30] sm:$0xff]  ;;  %v374_v14 = vshrl.u32 %v373_v13, 7  ;;  %s1026_s15 = scalar_lea.hbm %s1104_s3, %s622_s5  ;;  %s464_s4 = scalar_lea.sflag [#allocation3], %s960_s29 }
  0x24   : > { %640 = vmatprep.subr.mxu0 %v238_v2  ;;  %646 = vmatprep.mubr.msk.f32.mxu0 %vm240_vm0, %v228_v3  ;;  %v233_v9 = vld [vmem:[%s972_s11 + $0x28] sm:$0xff]  ;;  %v231_v11 = vld [vmem:[%s972_s11 + $0x18] sm:$0xff]  ;;  %s743_s7 = scalar_lea.vmem %s1020_s10, 128  ;;  %s868_s8 = smov [#allocation2]  }
  0x25   : > { %641 = vmatpush3.msra.mxu0 %v238_v2  ;;  %659 = vmatprep.subr.mxu1 %v238_v2  ;;  %v235_v12 = vld [vmem:[%s972_s11 + $0x38] sm:$0xff]  ;;  %v375_v15 = vadd.s32 8, %v374_v14  ;;  %v383_v18 = vadd.s32 %v382_v16, %v374_v14  ;;  %v377_v19 = vadd.s32 24, %v374_v14  ;;  %v376_v20 = vadd.s32 16, %v374_v14  ;;  %s495_s11 = sshll.u32 %s976_s21, 4  ;;  %p744_p1 = scmp.ne.s32.totalorder %s1020_s10, %s743_s7  ;;  %s1028_s11 = int_to_ptr.vmem [resolvable:$true] %s495_s11 }
  0x26   : > { %642 = vmatprep.subr.mxu0 %v237_v4  ;;  %663 = vmatpush3.msra.mxu1 %v238_v2  ;;  %v378_v21 = vadd.s32 32, %v374_v14  ;;  %v379_v22 = vadd.s32 40, %v374_v14  ;;  %v380_v29 = vadd.s32 48, %v374_v14  ;;  %v381_v36 = vadd.s32 56, %v374_v14  ;;  %s747_s9 = sshll.u32 %s868_s8, 4  ;;  %s748_s9 = int_to_ptr.vmem [resolvable:$false] %s747_s9 }
  0x27   : > { %643 = vmatpush3.msra.mxu0 %v237_v4  ;;  %660 = vmatprep.subr.mxu1 %v237_v4  ;;  %v384_v17 = vadd.s32 %v382_v16, %v375_v15  ;;  %vm391_vm2 = vcmp.lt.s32.totalorder %v383_v18, 250  ;;  %v386_v24 = vadd.s32 %v382_v16, %v377_v19  ;;  %v385_v25 = vadd.s32 %v382_v16, %v376_v20  ;;  %v423_v14 = vld [vmem:[%s974_s20] sm:$0x1]  ;;  %p745_p2 = pnand %p744_p1, %p939_p3  ;;  %s749_s26 = scalar_lea.vmem %s748_s9, 256 }
  0x28   : > { %644 = vmatprep.subr.mxu0 %v236_v5  ;;  %664 = vmatpush3.msra.mxu1 %v237_v4  ;;  %v387_v28 = vadd.s32 %v382_v16, %v378_v21  ;;  %v388_v32 = vadd.s32 %v382_v16, %v379_v22  ;;  %v389_v41 = vadd.s32 %v382_v16, %v380_v29  ;;  %p750_p5 = scmp.lt.s32.totalorder %s1020_s10, %s748_s9  ;;  %p751_p6 = scmp.lt.s32.totalorder %s749_s26, %s743_s7 }
  0x29   : > { %645 = vmatpush3.msra.mxu0 %v236_v5  ;;  %661 = vmatprep.subr.mxu1 %v236_v5  ;;  %vm392_vm1 = vcmp.lt.s32.totalorder %v384_v17, 250  ;;  %vm394_vm3 = vcmp.lt.s32.totalorder %v386_v24, 250  ;;  %vm393_vm4 = vcmp.lt.s32.totalorder %v385_v25, 250  ;;  %v390_v47 = vadd.s32 %v382_v16, %v381_v36  ;;  %v439_v17 = vld [vmem:[%s976_s21] sm:$0x1]  ;;  %p746_p4 = pneg %p745_p2 }
  0x2a   : > { %647 = vmatmul.mubr.msk.f32.vlgmr.msra.gmra.mxu0 %vm240_vm0, %v229_v6  ;;  %665 = vmatpush3.msra.mxu1 %v236_v5  ;;  %vm395_vm5 = vcmp.lt.s32.totalorder %v387_v28, 250  ;;  %vm396_vm6 = vcmp.lt.s32.totalorder %v388_v32, 250  ;;  %vm397_vm7 = vcmp.lt.s32.totalorder %v389_v41, 250  ;;  %p752_p7 = por %p751_p6, %p750_p5 }
  0x2b   : > { %649 = vmatprep.mubr.msk.f32.mxu0 %vm240_vm0, %v230_v7  ;;  %652 = vmatprep.mubr.msk.f32.mxu1 %vm240_vm0, %v232_v8  ;;  %vm398_vm8 = vcmp.lt.s32.totalorder %v390_v47, 250 }
  0x2c   : > { %653 = vmatmul.mubr.msk.f32.vlgmr.msra.gmra.mxu1 %vm240_vm0, %v233_v9  ;;  %p753_p8 = pnand %p752_p7, %p746_p4 }
  0x2d   : > { %655 = vmatprep.mubr.msk.f32.mxu1 %vm240_vm0, %v234_v10 }
  0x2e   : > { %650 = vmatmul.mubr.msk.f32.gmra.mxu0 %vm240_vm0, %v231_v11 }
  0x30   : > { %656 = vmatmul.mubr.msk.f32.gmra.mxu1 %vm240_vm0, %v235_v12 }
  0xea   : > { %v648_v23 = vpop.f32.mrf.mxu0 }
  0xeb   : > { %v416_v30 = vsel %vm392_vm1, %v648_v23, 0.0 }
  0xec   : > { %v331_v26 = vpop.f32.mrf.mxu0  ;;  %v654_v27 = vpop.f32.mrf.mxu1  ;;  %v441_v37 = vmul.f32 %v416_v30, %v416_v30 }
  0xed   : > { %v415_v31 = vsel %vm391_vm2, %v331_v26, 0.0  ;;  %v420_v53 = vsel %vm396_vm6, %v654_v27, 0.0 }
  0xee   : > { %v440_v33 = vmul.f32 %v415_v31, %v415_v31  ;;  %v651_v34 = vpop.f32.mrf.mxu0  ;;  %v351_v35 = vpop.f32.mrf.mxu1  ;;  %v424_v38 = vadd.f32 %v416_v30, %v415_v31  ;;  %v445_v58 = vmul.f32 %v420_v53, %v420_v53 }
  0xef   : > { %v418_v42 = vsel %vm394_vm3, %v651_v34, 0.0  ;;  %v419_v48 = vsel %vm395_vm5, %v351_v35, 0.0 }
  0xf0   : > { %v341_v39 = vpop.f32.mrf.mxu0  ;;  %v657_v40 = vpop.f32.mrf.mxu1  ;;  %v448_v44 = vadd.f32 %v441_v37, %v440_v33  ;;  %v443_v49 = vmul.f32 %v418_v42, %v418_v42  ;;  %v444_v55 = vmul.f32 %v419_v48, %v419_v48 }
  0xf1   : > { %v417_v43 = vsel %vm393_vm4, %v341_v39, 0.0  ;;  %v422_v61 = vsel %vm398_vm8, %v657_v40, 0.0 }
  0xf2   : > { %v425_v45 = vadd.f32 %v424_v38, %v417_v43  ;;  %v442_v46 = vmul.f32 %v417_v43, %v417_v43  ;;  %v361_v52 = vpop.f32.mrf.mxu1  ;;  %v447_v1 = vmul.f32 %v422_v61, %v422_v61 }
  0xf3   : > { %v421_v57 = vsel %vm397_vm7, %v361_v52, 0.0 }
  0xf4   : > { %v449_v50 = vadd.f32 %v448_v44, %v442_v46  ;;  %v426_v51 = vadd.f32 %v425_v45, %v418_v42  ;;  %v446_v63 = vmul.f32 %v421_v57, %v421_v57 }
  0xf6   : > { %v427_v54 = vadd.f32 %v426_v51, %v419_v48  ;;  %v450_v56 = vadd.f32 %v449_v50, %v443_v49 }
  0xf8   : > { %v451_v59 = vadd.f32 %v450_v56, %v444_v55  ;;  %v428_v60 = vadd.f32 %v427_v54, %v420_v53 }
  0xfa   : > { %v429_v62 = vadd.f32 %v428_v60, %v421_v57  ;;  %v452_v0 = vadd.f32 %v451_v59, %v445_v58 }
  0xfc   : > { %v430_v2 = vadd.f32 %v429_v62, %v422_v61  ;;  %v453_v3 = vadd.f32 %v452_v0, %v446_v63 }
  0xfe   : > { %v431_v4 = vrot.slane %v430_v2, 4  ;;  %v454_v5 = vadd.f32 %v453_v3, %v447_v1 }
 0x100   : > { %v432_v6 = vadd.f32 %v431_v4, %v430_v2  ;;  %v455_v7 = vrot.slane %v454_v5, 4 }
 0x102   : > { %v433_v8 = vrot.slane %v432_v6, 2  ;;  %v456_v9 = vadd.f32 %v455_v7, %v454_v5 }
 0x104   : > { %v434_v10 = vadd.f32 %v433_v8, %v432_v6  ;;  %v457_v11 = vrot.slane %v456_v9, 2 }
 0x106   : > { %v435_v12 = vrot.slane %v434_v10, 1  ;;  %v458_v13 = vadd.f32 %v457_v11, %v456_v9 }
 0x108   : > { %v436_v15 = vadd.f32 %v435_v12, %v434_v10  ;;  %v459_v16 = vrot.slane %v458_v13, 1 }
 0x10a   : > { %v437_v18 = vadd.f32 %v436_v15, %v423_v14  ;;  %v460_v19 = vadd.f32 %v459_v16, %v458_v13 }
 0x10c   : > { %438 = vst [vmem:[%s974_s20] sm:$0x1] %v437_v18  ;;  %v461_v20 = vadd.f32 %v460_v19, %v439_v17 }
 0x10d   : > { %756 = shalt.err (!%p753_p8)
}
 0x10e   : > { %s757_s20 = scalar_lea.hbm %s1018_s30, 128  ;;  %s761_s16 = scalar_lea.hbm %s1103_s2, 256 }
 0x10f   : > { %p758_p10 = scmp.ne.s32.totalorder %s1018_s30, %s757_s20  ;;  %p762_p13 = scmp.lt.s32.totalorder %s1018_s30, %s1103_s2 }
 0x110   : > { %p763_p0 = scmp.lt.s32.totalorder %s761_s16, %s757_s20 }
 0x111   : > { %p759_p11 = pnand %p758_p10, %p939_p3 }
 0x112   : > { %p764_p1 = por %p763_p0, %p762_p13 }
 0x113   : > { %p760_p12 = pneg %p759_p11 }
 0x115   : > { %p765_p2 = pnand %p764_p1, %p760_p12 }
 0x117   : > { %768 = shalt.err (!%p765_p2)
}
 0x118   : > { %666 = dma.vmem_to_hbm [thread:$0]  (%p939_p3), %s1020_s10, 128, %s1018_s30, %s464_s4   ;;  %462 = vst [vmem:[%s976_s21] sm:$0x1] %v461_v20 }
 0x119   : > { %s469_s7 = scalar_lea.sflag [#allocation5], %s960_s29  ;;  %s769_s9 = scalar_lea.vmem %s1028_s11, 128 }
 0x11a   : > { %p770_p4 = scmp.ne.s32.totalorder %s1028_s11, %s769_s9  ;;  %s869_s26 = smov [#allocation4]  }
 0x11b   : > { %s773_s20 = sshll.u32 %s869_s26, 4  ;;  %s774_s20 = int_to_ptr.vmem [resolvable:$false] %s773_s20 }
 0x11c   : > { %p771_p5 = pnand %p770_p4, %p939_p3  ;;  %s775_s5 = scalar_lea.vmem %s774_s20, 256 }
 0x11d   : > { %p776_p7 = scmp.lt.s32.totalorder %s1028_s11, %s774_s20  ;;  %p777_p8 = scmp.lt.s32.totalorder %s775_s5, %s769_s9 }
 0x11e   : > { %p772_p6 = pneg %p771_p5 }
 0x11f   : > { %p778_p10 = por %p777_p8, %p776_p7 }
 0x121   : > { %p779_p11 = pnand %p778_p10, %p772_p6 }
 0x123   : > { %782 = shalt.err (!%p779_p11)
}
 0x124   : > { %s783_s21 = scalar_lea.hbm %s1026_s15, 128  ;;  %s787_s30 = scalar_lea.hbm %s1104_s3, 256 }
 0x125   : > { %p784_p12 = scmp.ne.s32.totalorder %s1026_s15, %s783_s21  ;;  %p788_p1 = scmp.lt.s32.totalorder %s1026_s15, %s1104_s3 }
 0x126   : > { %p789_p2 = scmp.lt.s32.totalorder %s787_s30, %s783_s21 }
 0x127   : > { %p785_p13 = pnand %p784_p12, %p939_p3 }
 0x128   : > { %p790_p4 = por %p789_p2, %p788_p1 }
 0x129   : > { %p786_p0 = pneg %p785_p13 }
 0x12b   : > { %p791_p5 = pnand %p790_p4, %p786_p0 }
 0x12d   : > { %794 = shalt.err (!%p791_p5)
}
 0x12e   : > { %667 = dma.vmem_to_hbm [thread:$0]  (%p939_p3), %s1028_s11, 128, %s1026_s15, %s469_s7  }
 0x12f PF: > { %p677_p6 = scmp.ge.s32.totalorder %s865_s19, 2  ;;  %s507_s16 = sand.u32 1, %s837_s12  }
 0x130   : > { %s508_s6 = scalar_lea.sflag [#allocation3], %s507_s16 }
 0x131   : > { %p671_p7 = pnand %p677_p6, %p949_p9 }
 0x133   : > { %p672_p8 = pneg %p671_p7 }
 0x135   : > { %828 = dma.done.wait (%p672_p8), %s508_s6, 128  }
 0x136   : > { %830 = vsyncadd (%p672_p8), %s508_s6, 4294967168  ;;  %s517_s8 = scalar_lea.sflag [#allocation5], %s507_s16 }
 0x137   : > { %832 = dma.done.wait (%p672_p8), %s517_s8, 128  }
 0x138   : > { %834 = vsyncadd (%p672_p8), %s517_s8, 4294967168  ;;  %s20_s19 = sadd.s32 1, %s865_s19   ;;  %s1107_s12 = smov %s841_s13 }
 0x139   : > { %p17_p10 = scmp.ge.s32.totalorder %s20_s19, 6   ;;  %s1108_s13 = smov %s845_s14 }
 0x13a   : > { %s1109_s14 = smov %s957_s28  ;;  %s1110_s15 = smov %s857_s17 }
 0x13b   : > { %s1111_s16 = smov %s861_s18  ;;  %s1112_s17 = smov %s1115_s22 }
 0x13c   : > { %s1113_s18 = smov %s1119_s23  ;;  %19 = sbr.rel (!%p17_p10) target bundleno = 7 (0x7), region = 84 }
 0x141   :  { %522 = vsyncpa [#allocation3], 1 }
 0x142   :  { %524 = vsyncpa [#allocation3 + $0x1], 1 }
 0x143   :  { %525 = vsyncpa [#allocation5], 1 }
 0x144   :  { %527 = vsyncpa [#allocation5 + $0x1], 1 }

</bundles_post_ra>
